<compile_context>
chip_gen: v7x
topology: tpu7x:2x2x1
jax: 0.10.0
libtpu: 0.0.40
codegen_flags: <defaults>
</compile_context>

<pallas_src>
import functools

import jax
import jax.numpy as jnp
from jax.experimental import pallas as pl
from jax.experimental.pallas import tpu as pltpu


LANE = 128  # TPU lane width (hidden axis padded to this once, offline)


def _round_up(x, m):
    return (x + m - 1) // m * m


def _choose_row_tile(batch):
    # Big tiles amortize the ~0.35us/step pipeline overhead; keep roughly >= 4
    # grid steps (and always >= 2 when B > 128) so the "parallel" batch axis
    # can shard across v7x's 2 TensorCores.
    if batch <= 128:
        return batch                       # single block == full dim (legal)
    return max(128, min(1024, _round_up(pl.cdiv(batch, 4), 128)))


def _softplus(x):
    # numerically stable softplus: max/abs/exp/log only (VPU + EUP)
    return jnp.maximum(x, 0.0) + jnp.log(1.0 + jnp.exp(-jnp.abs(x)))


def _elu(x):
    # ELU(alpha=1): x if x > 0 else exp(x) - 1
    return jnp.where(x > 0.0, x, jnp.exp(jnp.minimum(x, 0.0)) - 1.0)


def _decoder_kernel(n_out, x_ref, w1_ref, b1_ref, w2_ref, b2_ref,
                    wmv_ref, bmv_ref, out_ref):
    # layer1: tanh(x @ W1 + b1)         (Dropout = identity at keep_prob=1.0)
    h0 = jnp.dot(x_ref[...], w1_ref[...], preferred_element_type=jnp.float32)
    h0 = jnp.tanh(h0 + b1_ref[...])

    # layer2: elu(h0 @ W2 + b2)
    h1 = jnp.dot(h0, w2_ref[...], preferred_element_type=jnp.float32)
    h1 = _elu(h1 + b2_ref[...])

    # fused heads: columns = [ mean | var_pre ]; softplus only on the var half.
    out = jnp.dot(h1, wmv_ref[...], preferred_element_type=jnp.float32)
    out = out + bmv_ref[...]
    col = jax.lax.broadcasted_iota(jnp.int32, out.shape, 1)
    out_ref[...] = jnp.where(col >= n_out, _softplus(out), out)


def prepare_params(w1, b1, w2, b2, w_mean, b_mean, w_var, b_var):
    """One-time weight preprocessing (hoisted out of the per-call forward).

    Pads the hidden axis to a lane multiple (padded units have zero
    weights/biases -> tanh(0)=0, elu(0)=0, zero contribution to the heads)
    and fuses the mean / var heads into a single (h_pad, 2*n_out) projection.
    """
    n_in, n_hidden = w1.shape
    n_out = w_mean.shape[1]
    h_pad = _round_up(n_hidden, LANE)
    f32 = jnp.float32

    w1p = jnp.zeros((n_in, h_pad), f32).at[:, :n_hidden].set(w1.astype(f32))
    b1p = jnp.zeros((1, h_pad), f32).at[:, :n_hidden].set(
        b1.reshape(1, -1).astype(f32))
    w2p = jnp.zeros((h_pad, h_pad), f32).at[:n_hidden, :n_hidden].set(
        w2.astype(f32))
    b2p = jnp.zeros((1, h_pad), f32).at[:, :n_hidden].set(
        b2.reshape(1, -1).astype(f32))

    wmv = jnp.zeros((h_pad, 2 * n_out), f32)
    wmv = wmv.at[:n_hidden, :n_out].set(w_mean.astype(f32))
    wmv = wmv.at[:n_hidden, n_out:].set(w_var.astype(f32))
    bmv = jnp.concatenate(
        [b_mean.reshape(1, -1), b_var.reshape(1, -1)], axis=1).astype(f32)
    return (w1p, b1p, w2p, b2p, wmv, bmv)


def vae_gauss_decoder(x, params):
    """Pallas forward of VAE_Gauss_Decoder.  `params` from prepare_params().

    Returns (mean, var), each (B, n_out) float32.
    """
    w1p, b1p, w2p, b2p, wmv, bmv = params
    B, n_in = x.shape
    h_pad = w1p.shape[1]
    p_out = wmv.shape[1]          # = 2 * n_out, no lane padding on the output
    n_out = p_out // 2

    row_tile = _choose_row_tile(B)
    grid = (pl.cdiv(B, row_tile),)     # ragged last block handled by Pallas
    resident = lambda shape: pl.BlockSpec(shape, lambda i: (0, 0))

    out = pl.pallas_call(
        functools.partial(_decoder_kernel, n_out),
        out_shape=jax.ShapeDtypeStruct((B, p_out), jnp.float32),
        grid=grid,
        in_specs=[
            pl.BlockSpec((row_tile, n_in), lambda i: (i, 0)),   # x row tile
            resident((n_in, h_pad)),                            # W1 (resident)
            resident((1, h_pad)),                               # b1
            resident((h_pad, h_pad)),                           # W2
            resident((1, h_pad)),                               # b2
            resident((h_pad, p_out)),                           # [Wm | Wv]
            resident((1, p_out)),                               # [bm | bv]
        ],
        out_specs=pl.BlockSpec((row_tile, p_out), lambda i: (i, 0)),
        compiler_params=pltpu.CompilerParams(
            dimension_semantics=("parallel",),
            vmem_limit_bytes=32 * 1024 * 1024,
        ),
    )(x.astype(jnp.float32), w1p, b1p, w2p, b2p, wmv, bmv)

    return out[:, :n_out], out[:, n_out:]


if __name__ == "__main__":
    key = jax.random.PRNGKey(0)
    ks = jax.random.split(key, 5)

    # small shapes consistent with the module's forward
    B, n_in, n_hidden, n_out = 256, 32, 64, 16

    def xavier_normal(k, fan_in, fan_out):
        std = jnp.sqrt(2.0 / (fan_in + fan_out))
        return std * jax.random.normal(k, (fan_in, fan_out), jnp.float32)

    x = jax.random.normal(ks[0], (B, n_in), jnp.float32)
    w1 = xavier_normal(ks[1], n_in, n_hidden)
    b1 = jnp.full((n_hidden,), 0.01, jnp.float32)
    w2 = xavier_normal(ks[2], n_hidden, n_hidden)
    b2 = jnp.full((n_hidden,), 0.01, jnp.float32)
    wm = xavier_normal(ks[3], n_hidden, n_out)
    bm = jnp.full((n_out,), 0.01, jnp.float32)
    wv = xavier_normal(ks[4], n_hidden, n_out)
    bv = jnp.full((n_out,), 0.01, jnp.float32)

    # one-time preprocessing (pad + fuse heads), outside the jitted forward
    params = prepare_params(w1, b1, w2, b2, wm, bm, wv, bv)
    params = jax.block_until_ready(params)

    fwd = jax.jit(vae_gauss_decoder)
    mean, var = fwd(x, params)
    jax.block_until_ready((mean, var))

    # pure-JAX f32 reference of the module forward
    h0_ref = jnp.tanh(jnp.dot(x, w1) + b1)
    h1_pre = jnp.dot(h0_ref, w2) + b2
    h1_ref = jnp.where(h1_pre > 0, h1_pre, jnp.expm1(jnp.minimum(h1_pre, 0.0)))
    mean_ref = jnp.dot(h1_ref, wm) + bm
    var_ref = jax.nn.softplus(jnp.dot(h1_ref, wv) + bv)

    assert mean.shape == (B, n_out) and var.shape == (B, n_out)
    assert bool(jnp.all(var >= 0.0))
    assert jnp.allclose(mean, mean_ref, atol=5e-3, rtol=5e-3)
    assert jnp.allclose(var, var_ref, atol=5e-3, rtol=5e-3)

    print("KERNEL_OK")
</pallas_src>

<mosaic_0001>
module attributes {stable_mosaic.version = 11 : i64} {
  func.func @_decoder_kernel(%arg0: i32, %arg1: memref<128x32xf32, #tpu.memory_space<vmem>>, %arg2: memref<32x128xf32, #tpu.memory_space<vmem>>, %arg3: memref<1x128xf32, #tpu.memory_space<vmem>>, %arg4: memref<128x128xf32, #tpu.memory_space<vmem>>, %arg5: memref<1x128xf32, #tpu.memory_space<vmem>>, %arg6: memref<128x32xf32, #tpu.memory_space<vmem>>, %arg7: memref<1x32xf32, #tpu.memory_space<vmem>>, %arg8: memref<128x32xf32, #tpu.memory_space<vmem>>) attributes {dimension_semantics = [#tpu.dimension_semantics<parallel>], iteration_bounds = array<i64: 2>, scalar_prefetch = 0 : i64, scratch_operands = 0 : i64, tpu.core_type = #tpu.core_type<tc>, window_params = [{transform_indices = @transform_0, window_bounds = array<i64: 128, 32>}, {pipeline_mode = #tpu.pipeline_mode<synchronous>, transform_indices = @transform_1, window_bounds = array<i64: 32, 128>}, {pipeline_mode = #tpu.pipeline_mode<synchronous>, transform_indices = @transform_2, window_bounds = array<i64: 1, 128>}, {pipeline_mode = #tpu.pipeline_mode<synchronous>, transform_indices = @transform_3, window_bounds = array<i64: 128, 128>}, {pipeline_mode = #tpu.pipeline_mode<synchronous>, transform_indices = @transform_4, window_bounds = array<i64: 1, 128>}, {pipeline_mode = #tpu.pipeline_mode<synchronous>, transform_indices = @transform_5, window_bounds = array<i64: 128, 32>}, {pipeline_mode = #tpu.pipeline_mode<synchronous>, transform_indices = @transform_6, window_bounds = array<i64: 1, 32>}, {transform_indices = @transform_7, window_bounds = array<i64: 128, 32>}]} {
    %c0 = arith.constant 0 : index
    %c0_0 = arith.constant 0 : index
    %0 = vector.load %arg1[%c0, %c0_0] : memref<128x32xf32, #tpu.memory_space<vmem>>, vector<128x32xf32>
    %c0_1 = arith.constant 0 : index
    %c0_2 = arith.constant 0 : index
    %1 = vector.load %arg2[%c0_1, %c0_2] : memref<32x128xf32, #tpu.memory_space<vmem>>, vector<32x128xf32>
    %cst = arith.constant dense<0.000000e+00> : vector<128x128xf32>
    %2 = tpu.matmul %0, %1, %cst {dimension_numbers = #tpu.dot_dimension_numbers<[1], [0], [0], [1], [0, 0, 1, 1], [], []>} : vector<128x32xf32>, vector<32x128xf32>, vector<128x128xf32> -> vector<128x128xf32>
    %c0_3 = arith.constant 0 : index
    %c0_4 = arith.constant 0 : index
    %3 = vector.load %arg3[%c0_3, %c0_4] : memref<1x128xf32, #tpu.memory_space<vmem>>, vector<1x128xf32>
    %4 = vector.broadcast %3 : vector<1x128xf32> to vector<128x128xf32>
    %5 = arith.addf %2, %4 : vector<128x128xf32>
    %6 = math.tanh %5 : vector<128x128xf32>
    %c0_5 = arith.constant 0 : index
    %c0_6 = arith.constant 0 : index
    %7 = vector.load %arg4[%c0_5, %c0_6] : memref<128x128xf32, #tpu.memory_space<vmem>>, vector<128x128xf32>
    %cst_7 = arith.constant dense<0.000000e+00> : vector<128x128xf32>
    %8 = tpu.matmul %6, %7, %cst_7 {dimension_numbers = #tpu.dot_dimension_numbers<[1], [0], [0], [1], [0, 0, 1, 1], [], []>} : vector<128x128xf32>, vector<128x128xf32>, vector<128x128xf32> -> vector<128x128xf32>
    %c0_8 = arith.constant 0 : index
    %c0_9 = arith.constant 0 : index
    %9 = vector.load %arg5[%c0_8, %c0_9] : memref<1x128xf32, #tpu.memory_space<vmem>>, vector<1x128xf32>
    %10 = vector.broadcast %9 : vector<1x128xf32> to vector<128x128xf32>
    %11 = arith.addf %8, %10 : vector<128x128xf32>
    %cst_10 = arith.constant 0.000000e+00 : f32
    %12 = vector.broadcast %cst_10 : f32 to vector<128x128xf32>
    %13 = arith.cmpf ogt, %11, %12 : vector<128x128xf32>
    %cst_11 = arith.constant 0.000000e+00 : f32
    %14 = vector.broadcast %cst_11 : f32 to vector<128x128xf32>
    %15 = arith.minimumf %11, %14 : vector<128x128xf32>
    %16 = math.exp %15 : vector<128x128xf32>
    %cst_12 = arith.constant 1.000000e+00 : f32
    %17 = vector.broadcast %cst_12 : f32 to vector<128x128xf32>
    %18 = arith.subf %16, %17 : vector<128x128xf32>
    %19 = arith.select %13, %11, %18 : vector<128x128xi1>, vector<128x128xf32>
    %c0_13 = arith.constant 0 : index
    %c0_14 = arith.constant 0 : index
    %20 = vector.load %arg6[%c0_13, %c0_14] : memref<128x32xf32, #tpu.memory_space<vmem>>, vector<128x32xf32>
    %cst_15 = arith.constant dense<0.000000e+00> : vector<128x32xf32>
    %21 = tpu.matmul %19, %20, %cst_15 {dimension_numbers = #tpu.dot_dimension_numbers<[1], [0], [0], [1], [0, 0, 1, 1], [], []>} : vector<128x128xf32>, vector<128x32xf32>, vector<128x32xf32> -> vector<128x32xf32>
    %c0_16 = arith.constant 0 : index
    %c0_17 = arith.constant 0 : index
    %22 = vector.load %arg7[%c0_16, %c0_17] : memref<1x32xf32, #tpu.memory_space<vmem>>, vector<1x32xf32>
    %23 = vector.broadcast %22 : vector<1x32xf32> to vector<128x32xf32>
    %24 = arith.addf %21, %23 : vector<128x32xf32>
    %25 = tpu.iota {dimensions = array<i32: 1>} : vector<128x32xi32>
    %c16_i32 = arith.constant 16 : i32
    %26 = vector.broadcast %c16_i32 : i32 to vector<128x32xi32>
    %27 = arith.cmpi sge, %25, %26 : vector<128x32xi32>
    %cst_18 = arith.constant 0.000000e+00 : f32
    %28 = vector.broadcast %cst_18 : f32 to vector<128x32xf32>
    %29 = arith.maximumf %24, %28 : vector<128x32xf32>
    %30 = math.absf %24 : vector<128x32xf32>
    %cst_19 = arith.constant 0.000000e+00 : f32
    %31 = vector.broadcast %cst_19 : f32 to vector<128x32xf32>
    %32 = arith.subf %31, %30 : vector<128x32xf32>
    %33 = math.exp %32 : vector<128x32xf32>
    %cst_20 = arith.constant 1.000000e+00 : f32
    %34 = vector.broadcast %cst_20 : f32 to vector<128x32xf32>
    %35 = arith.addf %34, %33 : vector<128x32xf32>
    %36 = math.log %35 : vector<128x32xf32>
    %37 = arith.addf %29, %36 : vector<128x32xf32>
    %38 = arith.select %27, %37, %24 : vector<128x32xi1>, vector<128x32xf32>
    %c0_21 = arith.constant 0 : index
    %c0_22 = arith.constant 0 : index
    %39 = vector.load %arg8[%c0_21, %c0_22] : memref<128x32xf32, #tpu.memory_space<vmem>>, vector<128x32xf32>
    tpu.vector_store %arg8[%c0_21, %c0_22], %38 {strides = array<i32>} : memref<128x32xf32, #tpu.memory_space<vmem>>, vector<128x32xf32>,
    return
  }
  func.func @transform_0(%arg0: i32) -> (i32, i32) {
    %c0_i32 = arith.constant 0 : i32
    %c0_i32_0 = arith.constant 0 : i32
    return %arg0, %c0_i32 : i32, i32
  }
  func.func @transform_1(%arg0: i32) -> (i32, i32) {
    %c0_i32 = arith.constant 0 : i32
    %c0_i32_0 = arith.constant 0 : i32
    %c0_i32_1 = arith.constant 0 : i32
    return %c0_i32, %c0_i32_0 : i32, i32
  }
  func.func @transform_2(%arg0: i32) -> (i32, i32) {
    %c0_i32 = arith.constant 0 : i32
    %c0_i32_0 = arith.constant 0 : i32
    %c0_i32_1 = arith.constant 0 : i32
    return %c0_i32, %c0_i32_0 : i32, i32
  }
  func.func @transform_3(%arg0: i32) -> (i32, i32) {
    %c0_i32 = arith.constant 0 : i32
    %c0_i32_0 = arith.constant 0 : i32
    %c0_i32_1 = arith.constant 0 : i32
    return %c0_i32, %c0_i32_0 : i32, i32
  }
  func.func @transform_4(%arg0: i32) -> (i32, i32) {
    %c0_i32 = arith.constant 0 : i32
    %c0_i32_0 = arith.constant 0 : i32
    %c0_i32_1 = arith.constant 0 : i32
    return %c0_i32, %c0_i32_0 : i32, i32
  }
  func.func @transform_5(%arg0: i32) -> (i32, i32) {
    %c0_i32 = arith.constant 0 : i32
    %c0_i32_0 = arith.constant 0 : i32
    %c0_i32_1 = arith.constant 0 : i32
    return %c0_i32, %c0_i32_0 : i32, i32
  }
  func.func @transform_6(%arg0: i32) -> (i32, i32) {
    %c0_i32 = arith.constant 0 : i32
    %c0_i32_0 = arith.constant 0 : i32
    %c0_i32_1 = arith.constant 0 : i32
    return %c0_i32, %c0_i32_0 : i32, i32
  }
  func.func @transform_7(%arg0: i32) -> (i32, i32) {
    %c0_i32 = arith.constant 0 : i32
    %c0_i32_0 = arith.constant 0 : i32
    return %arg0, %c0_i32 : i32, i32
  }
}

</mosaic_0001>

<bundles_post_ra>
// kernel: vae_gauss_decoder.1
= control target key start
LH: loop header
LB: loop body
LE: loop exit
PB: predicated region body
PF: predicated region fallthrough
CT: control target
= control target key end

     0   :  { %s1732_s24 = smov 0   ;;  %s2175_s0 = inlined_call_operand.vmem [shape: f32[256,32], index: 0, kind: input, shape index: {}]   ;;  %s2176_s1 = inlined_call_operand.vmem [shape: f32[32,128], index: 1, kind: input, shape index: {}]   ;;  %s2177_s2 = inlined_call_operand.vmem [shape: f32[1,128], index: 2, kind: input, shape index: {}]   ;;  %s2178_s3 = inlined_call_operand.vmem [shape: f32[128,128], index: 3, kind: input, shape index: {}]   ;;  %s2179_s4 = inlined_call_operand.vmem [shape: f32[1,128], index: 4, kind: input, shape index: {}]   ;;  %s2180_s5 = inlined_call_operand.vmem [shape: f32[128,32], index: 5, kind: input, shape index: {}]   ;;  %s2181_s6 = inlined_call_operand.vmem [shape: f32[1,32], index: 6, kind: input, shape index: {}]   ;;  %s2182_s7 = inlined_call_operand.vmem [shape: f32[256,32], index: 7, kind: output, shape index: {}]  }
   0x1 LB: > { %s1186_s25 = sadd.s32 4294967295, %s1690_s24   ;;  %p1190_p0 = scmp.ge.s32.totalorder %s1690_s24, 1  ;;  %s1690_s24 = sphi %s1732_s24, %s17_s24  }
   0x2   : > { %p238_p1 = scmp.lt.s32.totalorder %s1690_s24, 3 }
   0x4   : > { %p239_p2 = pnand %p1190_p0, %p238_p1 }
   0x5   : > { %v298_v0 = vld [vmem:[%s2176_s1] sm:$0xff] (!%p239_p2)  ;;  %v299_v1 = vld [vmem:[%s2176_s1 + $0x8] sm:$0xff] (!%p239_p2)  ;;  %v300_v2 = vld [vmem:[%s2176_s1 + $0x10] sm:$0xff] (!%p239_p2)  ;;  %s1191_s9 = sshll.u32 (!%p239_p2), %s1186_s25, 4  ;;  %vm309_vm0 = vcmask (!%p239_p2), 261120  }
   0x6   : > { %242 = sbr.rel (%p239_p2) target bundleno = 762 (0x2fa), region = 48  ;;  %v1460_v3 = vpack.c.bf16 (!%p239_p2), %v299_v1, %v298_v0  ;;  %v301_v4 = vld [vmem:[%s2176_s1 + $0x18] sm:$0xff] (!%p239_p2)  ;;  %p271_p3 = scmp.lt.s32.totalorder (!%p239_p2), %s1191_s9, 31  ;;  %v519_v5 = vld [vmem:[%s2178_s3] sm:$0xff] (!%p239_p2)  ;;  %v520_v6 = vld [vmem:[%s2178_s3 + $0x8] sm:$0xff] (!%p239_p2) }
   0x7   : > { %v1464_v7 = vpack.c.bf16 (!%p239_p2), %v301_v4, %v300_v2  ;;  %v1468_v8 = vpack.c.bf16 (!%p239_p2), %v520_v6, %v519_v5  ;;  %v521_v9 = vld [vmem:[%s2178_s3 + $0x10] sm:$0xff] (!%p239_p2)  ;;  %v522_v10 = vld [vmem:[%s2178_s3 + $0x18] sm:$0xff] (!%p239_p2)  ;;  %v523_v12 = vld [vmem:[%s2178_s3 + $0x20] sm:$0xff] (!%p239_p2) }
   0x8   : > { %1461 = vmatprep.subr.bf16.mxu0 (!%p239_p2), %v1460_v3  ;;  %v1472_v11 = vpack.c.bf16 (!%p239_p2), %v522_v10, %v521_v9  ;;  %v524_v13 = vld [vmem:[%s2178_s3 + $0x28] sm:$0xff] (!%p239_p2)  ;;  %v525_v16 = vld [vmem:[%s2178_s3 + $0x30] sm:$0xff] (!%p239_p2)  ;;  %v526_v17 = vld [vmem:[%s2178_s3 + $0x38] sm:$0xff] (!%p239_p2) }
   0x9   : > { %1463 = vmatpush3.bf16.msra.mxu0 (!%p239_p2), %v1460_v3  ;;  %1469 = vmatprep.subr.bf16.mxu1 (!%p239_p2), %v1468_v8  ;;  %v1476_v14 = vpack.c.bf16 (!%p239_p2), %v524_v13, %v523_v12  ;;  %v1480_v20 = vpack.c.bf16 (!%p239_p2), %v526_v17, %v525_v16  ;;  %v527_v34 = vld [vmem:[%s2178_s3 + $0x40] sm:$0xff] (!%p239_p2)  ;;  %v528_v35 = vld [vmem:[%s2178_s3 + $0x48] sm:$0xff] (!%p239_p2)  ;;  %v529_v37 = vld [vmem:[%s2178_s3 + $0x50] sm:$0xff] (!%p239_p2) }
   0xa   : > { %1465 = vmatprep.subr.bf16.mxu0 (!%p239_p2), %v1464_v7  ;;  %1471 = vmatpush3.bf16.msra.mxu1 (!%p239_p2), %v1468_v8  ;;  %v1484_v36 = vpack.c.bf16 (!%p239_p2), %v528_v35, %v527_v34  ;;  %v530_v38 = vld [vmem:[%s2178_s3 + $0x58] sm:$0xff] (!%p239_p2)  ;;  %v531_v40 = vld [vmem:[%s2178_s3 + $0x60] sm:$0xff] (!%p239_p2)  ;;  %v532_v41 = vld [vmem:[%s2178_s3 + $0x68] sm:$0xff] (!%p239_p2) }
   0xb   : > { %1473 = vmatprep.subr.bf16.mxu1 (!%p239_p2), %v1472_v11  ;;  %v1488_v39 = vpack.c.bf16 (!%p239_p2), %v530_v38, %v529_v37  ;;  %v1492_v42 = vpack.c.bf16 (!%p239_p2), %v532_v41, %v531_v40  ;;  %v533_v43 = vld [vmem:[%s2178_s3 + $0x70] sm:$0xff] (!%p239_p2)  ;;  %v534_v44 = vld [vmem:[%s2178_s3 + $0x78] sm:$0xff] (!%p239_p2)  ;;  %v783_v46 = vld [vmem:[%s2180_s5] sm:$0xff] (!%p239_p2) }
   0xc   : > { %v1496_v45 = vpack.c.bf16 (!%p239_p2), %v534_v44, %v533_v43  ;;  %v784_v47 = vld [vmem:[%s2180_s5 + $0x8] sm:$0xff] (!%p239_p2)  ;;  %v785_v48 = vld [vmem:[%s2180_s5 + $0x10] sm:$0xff] (!%p239_p2)  ;;  %v786_v50 = vld [vmem:[%s2180_s5 + $0x18] sm:$0xff] (!%p239_p2) }
   0xd   : > { %s2184_s9 = smov (!%p271_p3, %s1191_s9), 31  ;;  %1467 = vmatpush3.bf16.msra.mxu0 %v1464_v7  ;;  %v1500_v49 = vpack.c.bf16 %v784_v47, %v783_v46  ;;  %v1504_v51 = vpack.c.bf16 %v786_v50, %v785_v48  ;;  %v787_v52 = vld [vmem:[%s2180_s5 + $0x20] sm:$0xff]  ;;  %v788_v53 = vld [vmem:[%s2180_s5 + $0x28] sm:$0xff]  ;;  %v789_v40 = vld [vmem:[%s2180_s5 + $0x30] sm:$0xff] }
   0xe   : > { %s1192_s25 = sshll.u32 %s2184_s9, 3  ;;  %1475 = vmatpush3.bf16.msra.mxu1 %v1472_v11  ;;  %v1508_v54 = vpack.c.bf16 %v788_v53, %v787_v52  ;;  %v1863_v55 = vld [vmem:[%s2177_s2] ss:$0 sm:$0xff]  ;;  %v790_v41 = vld [vmem:[%s2180_s5 + $0x38] sm:$0xff]  ;;  %v792_v44 = vld [vmem:[%s2180_s5 + $0x48] sm:$0xff] }
   0xf   : > { %s1778_s28 = scalar_lea.vmem %s2175_s0, %s1192_s25  ;;  %1477 = vmatprep.subr.bf16.mxu1 %v1476_v14  ;;  %1501 = vmatprep.subr.bf16.mxu0 %v1500_v49  ;;  %v791_v43 = vld [vmem:[%s2180_s5 + $0x40] sm:$0xff]  ;;  %v793_v46 = vld [vmem:[%s2180_s5 + $0x50] sm:$0xff]  ;;  %v794_v47 = vld [vmem:[%s2180_s5 + $0x58] sm:$0xff]  ;;  %s2077_s29 = scalar_lea.vmem %s2182_s7, %s1192_s25 }
  0x10   : > { %v282_v15 = vld [vmem:[%s1778_s28] sm:$0xff]  ;;  %v283_v18 = vld [vmem:[%s1778_s28 + $0x8] sm:$0xff]  ;;  %v284_v19 = vld [vmem:[%s1778_s28 + $0x10] sm:$0xff]  ;;  %v1520_v48 = vpack.c.bf16 %v794_v47, %v793_v46 }
  0x11   : > { %1324 = vmatprep.mubr.msk.f32.mxu0 %vm309_vm0, %v282_v15  ;;  %v285_v21 = vld [vmem:[%s1778_s28 + $0x18] sm:$0xff]  ;;  %v286_v22 = vld [vmem:[%s1778_s28 + $0x20] sm:$0xff]  ;;  %v287_v23 = vld [vmem:[%s1778_s28 + $0x28] sm:$0xff] }
  0x12   : > { %1325 = vmatmul.mubr.msk.f32.vlgmr.msra.gmra.mrb[0].mxu0 %vm309_vm0, %v283_v18  ;;  %1479 = vmatpush3.bf16.msra.mxu1 %v1476_v14  ;;  %v288_v24 = vld [vmem:[%s1778_s28 + $0x30] sm:$0xff]  ;;  %v289_v25 = vld [vmem:[%s1778_s28 + $0x38] sm:$0xff]  ;;  %v290_v26 = vld [vmem:[%s1778_s28 + $0x40] sm:$0xff] }
  0x13   : > { %1327 = vmatprep.mubr.msk.f32.mxu0 %vm309_vm0, %v284_v19  ;;  %1481 = vmatprep.subr.bf16.mxu1 %v1480_v20  ;;  %v291_v27 = vld [vmem:[%s1778_s28 + $0x48] sm:$0xff]  ;;  %v292_v28 = vld [vmem:[%s1778_s28 + $0x50] sm:$0xff]  ;;  %v293_v29 = vld [vmem:[%s1778_s28 + $0x58] sm:$0xff] }
  0x14   : > { %v294_v30 = vld [vmem:[%s1778_s28 + $0x60] sm:$0xff]  ;;  %v295_v31 = vld [vmem:[%s1778_s28 + $0x68] sm:$0xff]  ;;  %v296_v32 = vld [vmem:[%s1778_s28 + $0x70] sm:$0xff]  ;;  %1503 = vmatpush3.bf16.msra.mxu0 %v1500_v49 }
  0x15   : > { %v297_v33 = vld [vmem:[%s1778_s28 + $0x78] sm:$0xff]  ;;  %1505 = vmatprep.subr.bf16.mxu0 %v1504_v51  ;;  %v796_v50 = vld [vmem:[%s2180_s5 + $0x68] sm:$0xff]  ;;  %v797_v52 = vld [vmem:[%s2180_s5 + $0x70] sm:$0xff] }
  0x16   : > { %1328 = vmatmul.mubr.msk.f32.gmra.mrb[2].mxu0 %vm309_vm0, %v285_v21  ;;  %1483 = vmatpush3.bf16.msra.mxu1 %v1480_v20  ;;  %v798_v53 = vld [vmem:[%s2180_s5 + $0x78] sm:$0xff] }
  0x17   : > { %1330 = vmatprep.mubr.msk.f32.mxu0 %vm309_vm0, %v286_v22  ;;  %1485 = vmatprep.subr.bf16.mxu1 %v1484_v36 }
  0x18   : > { %1507 = vmatpush3.bf16.msra.mxu0 %v1504_v51 }
  0x19   : > { %1509 = vmatprep.subr.bf16.mxu0 %v1508_v54 }
  0x1a   : > { %1331 = vmatmul.mubr.msk.f32.gmra.mrb[4].mxu0 %vm309_vm0, %v287_v23  ;;  %1487 = vmatpush3.bf16.msra.mxu1 %v1484_v36 }
  0x1b   : > { %1333 = vmatprep.mubr.msk.f32.mxu0 %vm309_vm0, %v288_v24  ;;  %1489 = vmatprep.subr.bf16.mxu1 %v1488_v39 }
  0x1c   : > { %1511 = vmatpush3.bf16.msra.mxu0 %v1508_v54 }
  0x1e   : > { %1334 = vmatmul.mubr.msk.f32.gmra.mrb[6].mxu0 %vm309_vm0, %v289_v25  ;;  %1491 = vmatpush3.bf16.msra.mxu1 %v1488_v39 }
  0x1f   : > { %1336 = vmatprep.mubr.msk.f32.mxu0 %vm309_vm0, %v290_v26  ;;  %1493 = vmatprep.subr.bf16.mxu1 %v1492_v42 }
  0x22   : > { %1337 = vmatmul.mubr.msk.f32.gmra.mrb[8].mxu0 %vm309_vm0, %v291_v27  ;;  %1495 = vmatpush3.bf16.msra.mxu1 %v1492_v42  ;;  %v1512_v42 = vpack.c.bf16 %v790_v41, %v789_v40 }
  0x23   : > { %1339 = vmatprep.mubr.msk.f32.mxu0 %vm309_vm0, %v292_v28  ;;  %1497 = vmatprep.subr.bf16.mxu1 %v1496_v45 }
  0x24   : > { %1513 = vmatprep.subr.bf16.mxu0 %v1512_v42 }
  0x25   : > { %1515 = vmatpush3.bf16.msra.mxu0 %v1512_v42 }
  0x26   : > { %1340 = vmatmul.mubr.msk.f32.gmra.mrb[10].mxu0 %vm309_vm0, %v293_v29  ;;  %1499 = vmatpush3.bf16.msra.mxu1 %v1496_v45  ;;  %v1516_v45 = vpack.c.bf16 %v792_v44, %v791_v43 }
  0x27   : > { %1342 = vmatprep.mubr.msk.f32.mxu0 %vm309_vm0, %v294_v30  ;;  %1532 = vmatprep.subr.bf16.mxu1 %v1500_v49 }
  0x28   : > { %1517 = vmatprep.subr.bf16.mxu0 %v1516_v45 }
  0x29   : > { %1519 = vmatpush3.bf16.msra.mxu0 %v1516_v45 }
  0x2a   : > { %1343 = vmatmul.mubr.msk.f32.gmra.mrb[12].mxu0 %vm309_vm0, %v295_v31  ;;  %1521 = vmatprep.subr.bf16.mxu0 %v1520_v48 }
  0x2b   : > { %1345 = vmatprep.mubr.msk.f32.mxu0 %vm309_vm0, %v296_v32 }
  0x2d   : > { %1523 = vmatpush3.bf16.msra.mxu0 %v1520_v48 }
  0x2e   : > { %1346 = vmatmul.mubr.msk.f32.gmra.mrb[14].mxu0 %vm309_vm0, %v297_v33 }
  0xe5   : > { %v1326_v56 = vpop.f32.mrb[0].mxu0 }
  0xe6   : > { %v430_v57 = vadd.f32 %v1326_v56, %v1863_v55  ;;  %v424_v58 = vpop.f32.mrb[1].mxu0 }
  0xe7   : > { %v425_v59 = vadd.f32 %v1863_v55, %v424_v58 }
  0xe9   : > { %1556 = vtanh.f32 %v425_v59  ;;  %v1329_v60 = vpop.f32.mrb[2].mxu0 }
  0xea   : > { %1558 = vtanh.f32 %v430_v57  ;;  %v440_v61 = vadd.f32 %v1329_v60, %v1863_v55  ;;  %v434_v62 = vpop.f32.mrb[3].mxu0 }
  0xeb   : > { %v435_v63 = vadd.f32 %v1863_v55, %v434_v62 }
  0xed   : > { %1560 = vtanh.f32 %v435_v63  ;;  %v1332_v0 = vpop.f32.mrb[4].mxu0 }
  0xee   : > { %1562 = vtanh.f32 %v440_v61  ;;  %v450_v1 = vadd.f32 %v1332_v0, %v1863_v55  ;;  %v444_v2 = vpop.f32.mrb[5].mxu0 }
  0xef   : > { %v445_v3 = vadd.f32 %v1863_v55, %v444_v2 }
  0xf1   : > { %1564 = vtanh.f32 %v445_v3  ;;  %v1335_v4 = vpop.f32.mrb[6].mxu0 }
  0xf2   : > { %1566 = vtanh.f32 %v450_v1  ;;  %v460_v5 = vadd.f32 %v1335_v4, %v1863_v55  ;;  %v454_v6 = vpop.f32.mrb[7].mxu0 }
  0xf3   : > { %v1557_v7 = vpop.eup %1556  ;;  %v455_v8 = vadd.f32 %v1863_v55, %v454_v6 }
  0xf4   : > { %v1559_v9 = vpop.eup %1558  ;;  %1380 = vmatprep.mubr.f32.mxu1 %v1557_v7 }
  0xf5   : > { %1568 = vtanh.f32 %v455_v8  ;;  %v1338_v10 = vpop.f32.mrb[8].mxu0  ;;  %1381 = vmatmul.mubr.f32.vlgmr.msra.gmra.mrb[0].mxu1 %v1559_v9 }
  0xf6   : > { %1570 = vtanh.f32 %v460_v5  ;;  %v470_v11 = vadd.f32 %v1338_v10, %v1863_v55  ;;  %v464_v12 = vpop.f32.mrb[9].mxu0  ;;  %1540 = vmatpush3.bf16.msra.mxu1 %v1500_v49  ;;  %v795_v49 = vld [vmem:[%s2180_s5 + $0x60] sm:$0xff] }
  0xf7   : > { %v1561_v13 = vpop.eup %1560  ;;  %v465_v14 = vadd.f32 %v1863_v55, %v464_v12  ;;  %1533 = vmatprep.subr.bf16.mxu1 %v1504_v51 }
  0xf8   : > { %v1563_v15 = vpop.eup %1562  ;;  %1383 = vmatprep.mubr.f32.mxu1 %v1561_v13 }
  0xf9   : > { %1572 = vtanh.f32 %v465_v14  ;;  %v1341_v16 = vpop.f32.mrb[10].mxu0  ;;  %1384 = vmatmul.mubr.f32.gmra.mrb[2].mxu1 %v1563_v15 }
  0xfa   : > { %1574 = vtanh.f32 %v470_v11  ;;  %v480_v17 = vadd.f32 %v1341_v16, %v1863_v55  ;;  %v474_v18 = vpop.f32.mrb[11].mxu0  ;;  %1541 = vmatpush3.bf16.msra.mxu1 %v1504_v51  ;;  %v1524_v51 = vpack.c.bf16 %v796_v50, %v795_v49 }
  0xfb   : > { %v1565_v19 = vpop.eup %1564  ;;  %v475_v20 = vadd.f32 %v1863_v55, %v474_v18  ;;  %1534 = vmatprep.subr.bf16.mxu1 %v1508_v54 }
  0xfc   : > { %v1567_v21 = vpop.eup %1566  ;;  %1386 = vmatprep.mubr.f32.mxu1 %v1565_v19  ;;  %1525 = vmatprep.subr.bf16.mxu0 %v1524_v51 }
  0xfd   : > { %1576 = vtanh.f32 %v475_v20  ;;  %v1344_v22 = vpop.f32.mrb[12].mxu0  ;;  %1387 = vmatmul.mubr.f32.gmra.mrb[4].mxu1 %v1567_v21  ;;  %1527 = vmatpush3.bf16.msra.mxu0 %v1524_v51 }
  0xfe   : > { %1578 = vtanh.f32 %v480_v17  ;;  %v490_v23 = vadd.f32 %v1344_v22, %v1863_v55  ;;  %v484_v24 = vpop.f32.mrb[13].mxu0  ;;  %1542 = vmatpush3.bf16.msra.mxu1 %v1508_v54  ;;  %v1528_v54 = vpack.c.bf16 %v798_v53, %v797_v52 }
  0xff   : > { %v1569_v25 = vpop.eup %1568  ;;  %v485_v26 = vadd.f32 %v1863_v55, %v484_v24  ;;  %1535 = vmatprep.subr.bf16.mxu1 %v1512_v42 }
 0x100   : > { %v1571_v27 = vpop.eup %1570  ;;  %1389 = vmatprep.mubr.f32.mxu1 %v1569_v25  ;;  %1529 = vmatprep.subr.bf16.mxu0 %v1528_v54 }
 0x101   : > { %1580 = vtanh.f32 %v485_v26  ;;  %v1347_v28 = vpop.f32.mrb[14].mxu0  ;;  %1390 = vmatmul.mubr.f32.gmra.mrb[6].mxu1 %v1571_v27  ;;  %1531 = vmatpush3.bf16.msra.mxu0 %v1528_v54 }
 0x102   : > { %1582 = vtanh.f32 %v490_v23  ;;  %v500_v29 = vadd.f32 %v1347_v28, %v1863_v55  ;;  %v494_v30 = vpop.f32.mrb[15].mxu0  ;;  %1543 = vmatpush3.bf16.msra.mxu1 %v1512_v42 }
 0x103   : > { %v1573_v31 = vpop.eup %1572  ;;  %v495_v32 = vadd.f32 %v1863_v55, %v494_v30  ;;  %1536 = vmatprep.subr.bf16.mxu1 %v1516_v45  ;;  %v1914_v55 = vld [vmem:[%s2179_s4] ss:$0 sm:$0xff] }
 0x104   : > { %v1575_v33 = vpop.eup %1574  ;;  %1392 = vmatprep.mubr.f32.mxu1 %v1573_v31 }
 0x105   : > { %1584 = vtanh.f32 %v495_v32  ;;  %1393 = vmatmul.mubr.f32.gmra.mrb[8].mxu1 %v1575_v33 }
 0x106   : > { %1586 = vtanh.f32 %v500_v29  ;;  %1544 = vmatpush3.bf16.msra.mxu1 %v1516_v45 }
 0x107   : > { %v1577_v34 = vpop.eup %1576  ;;  %1537 = vmatprep.subr.bf16.mxu1 %v1520_v48 }
 0x108   : > { %v1579_v35 = vpop.eup %1578  ;;  %1395 = vmatprep.mubr.f32.mxu1 %v1577_v34 }
 0x109   : > { %1396 = vmatmul.mubr.f32.gmra.mrb[10].mxu1 %v1579_v35 }
 0x10a   : > { %1545 = vmatpush3.bf16.msra.mxu1 %v1520_v48 }
 0x10b   : > { %v1581_v36 = vpop.eup %1580  ;;  %1538 = vmatprep.subr.bf16.mxu1 %v1524_v51 }
 0x10c   : > { %v1583_v37 = vpop.eup %1582  ;;  %1398 = vmatprep.mubr.f32.mxu1 %v1581_v36 }
 0x10d   : > { %1399 = vmatmul.mubr.f32.gmra.mrb[12].mxu1 %v1583_v37 }
 0x10e   : > { %1546 = vmatpush3.bf16.msra.mxu1 %v1524_v51 }
 0x10f   : > { %v1585_v38 = vpop.eup %1584  ;;  %1539 = vmatprep.subr.bf16.mxu1 %v1528_v54 }
 0x110   : > { %v1587_v39 = vpop.eup %1586  ;;  %1401 = vmatprep.mubr.f32.mxu1 %v1585_v38 }
 0x111   : > { %1402 = vmatmul.mubr.f32.gmra.mrb[14].mxu1 %v1587_v39 }
 0x112   : > { %1547 = vmatpush3.bf16.msra.mxu1 %v1528_v54 }
 0x1c8   : > { %v1382_v56 = vpop.f32.mrb[0].mxu1 }
 0x1c9   : > { %v614_v57 = vadd.f32 %v1382_v56, %v1914_v55  ;;  %v608_v58 = vpop.f32.mrb[1].mxu1 }
 0x1ca   : > { %v609_v59 = vadd.f32 %v1914_v55, %v608_v58 }
 0x1cb   : > { %v704_v60 = vmin.f32 %v614_v57, 0.0  ;;  %vm688_vm2 = vcmp.gt.f32.partialorder %v614_v57, 0.0 }
 0x1cc   : > { %v703_v61 = vmin.f32 %v609_v59, 0.0  ;;  %v1385_v62 = vpop.f32.mrb[2].mxu1  ;;  %vm687_vm1 = vcmp.gt.f32.partialorder %v609_v59, 0.0 }
 0x1cd   : > { %v721_v63 = vmul.f32 1.442695, %v704_v60  ;;  %v1919_v0 = vadd.f32 %v1385_v62, %v1914_v55  ;;  %v618_v1 = vpop.f32.mrb[3].mxu1 }
 0x1ce   : > { %v719_v2 = vmul.f32 1.442695, %v703_v61  ;;  %v1922_v3 = vadd.f32 %v1914_v55, %v618_v1 }
 0x1cf   : > { %1588 = vpow2.f32 %v721_v63  ;;  %v706_v4 = vmin.f32 %v1919_v0, 0.0  ;;  %vm690_vm4 = vcmp.gt.f32.partialorder %v1919_v0, 0.0 }
 0x1d0   : > { %1590 = vpow2.f32 %v719_v2  ;;  %v705_v5 = vmin.f32 %v1922_v3, 0.0  ;;  %v1388_v6 = vpop.f32.mrb[4].mxu1  ;;  %vm689_vm3 = vcmp.gt.f32.partialorder %v1922_v3, 0.0 }
 0x1d1   : > { %v725_v7 = vmul.f32 1.442695, %v706_v4  ;;  %v1927_v8 = vadd.f32 %v1388_v6, %v1914_v55  ;;  %v628_v9 = vpop.f32.mrb[5].mxu1 }
 0x1d2   : > { %v723_v10 = vmul.f32 1.442695, %v705_v5  ;;  %v1930_v11 = vadd.f32 %v1914_v55, %v628_v9 }
 0x1d3   : > { %1592 = vpow2.f32 %v725_v7  ;;  %v708_v12 = vmin.f32 %v1927_v8, 0.0  ;;  %vm692_vm6 = vcmp.gt.f32.partialorder %v1927_v8, 0.0 }
 0x1d4   : > { %1594 = vpow2.f32 %v723_v10  ;;  %v707_v13 = vmin.f32 %v1930_v11, 0.0  ;;  %v1391_v14 = vpop.f32.mrb[6].mxu1  ;;  %vm691_vm5 = vcmp.gt.f32.partialorder %v1930_v11, 0.0 }
 0x1d5   : > { %v729_v15 = vmul.f32 1.442695, %v708_v12  ;;  %v1935_v16 = vadd.f32 %v1391_v14, %v1914_v55  ;;  %v638_v17 = vpop.f32.mrb[7].mxu1 }
 0x1d6   : > { %v727_v18 = vmul.f32 1.442695, %v707_v13  ;;  %v1938_v19 = vadd.f32 %v1914_v55, %v638_v17 }
 0x1d7   : > { %1596 = vpow2.f32 %v729_v15  ;;  %v710_v20 = vmin.f32 %v1935_v16, 0.0  ;;  %vm694_vm8 = vcmp.gt.f32.partialorder %v1935_v16, 0.0 }
 0x1d8   : > { %1598 = vpow2.f32 %v727_v18  ;;  %v709_v21 = vmin.f32 %v1938_v19, 0.0  ;;  %v1394_v22 = vpop.f32.mrb[8].mxu1  ;;  %vm693_vm7 = vcmp.gt.f32.partialorder %v1938_v19, 0.0 }
 0x1d9   : > { %v1589_v23 = vpop.eup %1588  ;;  %v733_v24 = vmul.f32 1.442695, %v710_v20  ;;  %v1943_v25 = vadd.f32 %v1394_v22, %v1914_v55  ;;  %v648_v26 = vpop.f32.mrb[9].mxu1 }
 0x1da   : > { %v1591_v27 = vpop.eup %1590  ;;  %v1214_v28 = vadd.f32 -1.0, %v1589_v23  ;;  %v731_v29 = vmul.f32 1.442695, %v709_v21  ;;  %v1946_v30 = vadd.f32 %v1914_v55, %v648_v26 }
 0x1db   : > { %1600 = vpow2.f32 %v733_v24  ;;  %v712_v31 = vmin.f32 %v1943_v25, 0.0  ;;  %v1213_v32 = vadd.f32 -1.0, %v1591_v27  ;;  %vm696_vm10 = vcmp.gt.f32.partialorder %v1943_v25, 0.0 }
 0x1dc   : > { %1602 = vpow2.f32 %v731_v29  ;;  %v711_v33 = vmin.f32 %v1946_v30, 0.0  ;;  %v1397_v34 = vpop.f32.mrb[10].mxu1  ;;  %v768_v41 = vsel %vm688_vm2, %v614_v57, %v1214_v28  ;;  %vm695_vm9 = vcmp.gt.f32.partialorder %v1946_v30, 0.0 }
 0x1dd   : > { %v1593_v35 = vpop.eup %1592  ;;  %v737_v36 = vmul.f32 1.442695, %v712_v31  ;;  %v1951_v37 = vadd.f32 %v1397_v34, %v1914_v55  ;;  %v658_v38 = vpop.f32.mrb[11].mxu1  ;;  %v767_v39 = vsel %vm687_vm1, %v609_v59, %v1213_v32 }
 0x1de   : > { %v1595_v40 = vpop.eup %1594  ;;  %v735_v42 = vmul.f32 1.442695, %v711_v33  ;;  %v1954_v43 = vadd.f32 %v1914_v55, %v658_v38  ;;  %1436 = vmatprep.mubr.f32.mxu0 %v767_v39  ;;  %v1216_v44 = vadd.f32 -1.0, %v1593_v35 }
 0x1df   : > { %1604 = vpow2.f32 %v737_v36  ;;  %v714_v45 = vmin.f32 %v1951_v37, 0.0  ;;  %1437 = vmatmul.mubr.f32.vlgmr.msra.gmra.mrb[16].mxu0 %v768_v41  ;;  %v1215_v46 = vadd.f32 -1.0, %v1595_v40  ;;  %vm698_vm12 = vcmp.gt.f32.partialorder %v1951_v37, 0.0  ;;  %v2000_v40 = vld [vmem:[%s2181_s6] ss:$0 sm:$0xff] }
 0x1e0   : > { %1606 = vpow2.f32 %v735_v42  ;;  %v713_v47 = vmin.f32 %v1954_v43, 0.0  ;;  %v1400_v48 = vpop.f32.mrb[12].mxu1  ;;  %v770_v58 = vsel %vm690_vm4, %v1919_v0, %v1216_v44  ;;  %vm697_vm11 = vcmp.gt.f32.partialorder %v1954_v43, 0.0 }
 0x1e1   : > { %v1597_v49 = vpop.eup %1596  ;;  %v741_v50 = vmul.f32 1.442695, %v714_v45  ;;  %v1960_v51 = vadd.f32 %v1400_v48, %v1914_v55  ;;  %v668_v52 = vpop.f32.mrb[13].mxu1  ;;  %v769_v53 = vsel %vm689_vm3, %v1922_v3, %v1215_v46 }
 0x1e2   : > { %v1599_v54 = vpop.eup %1598  ;;  %v739_v56 = vmul.f32 1.442695, %v713_v47  ;;  %v1965_v57 = vadd.f32 %v1914_v55, %v668_v52  ;;  %1439 = vmatprep.mubr.f32.mxu0 %v769_v53  ;;  %v1218_v59 = vadd.f32 -1.0, %v1597_v49 }
 0x1e3   : > { %1608 = vpow2.f32 %v741_v50  ;;  %v716_v60 = vmin.f32 %v1960_v51, 0.0  ;;  %1440 = vmatmul.mubr.f32.gmra.mrb[18].mxu0 %v770_v58  ;;  %v1217_v61 = vadd.f32 -1.0, %v1599_v54  ;;  %vm700_vm14 = vcmp.gt.f32.partialorder %v1960_v51, 0.0 }
 0x1e4   : > { %1610 = vpow2.f32 %v739_v56  ;;  %v715_v62 = vmin.f32 %v1965_v57, 0.0  ;;  %v1403_v63 = vpop.f32.mrb[14].mxu1  ;;  %v772_v9 = vsel %vm692_vm6, %v1927_v8, %v1218_v59  ;;  %vm699_vm13 = vcmp.gt.f32.partialorder %v1965_v57, 0.0 }
 0x1e5   : > { %v1601_v1 = vpop.eup %1600  ;;  %v745_v2 = vmul.f32 1.442695, %v716_v60  ;;  %v1972_v3 = vadd.f32 %v1403_v63, %v1914_v55  ;;  %v678_v4 = vpop.f32.mrb[15].mxu1  ;;  %v771_v0 = vsel %vm691_vm5, %v1930_v11, %v1217_v61 }
 0x1e6   : > { %v1603_v5 = vpop.eup %1602  ;;  %v743_v6 = vmul.f32 1.442695, %v715_v62  ;;  %v679_v7 = vadd.f32 %v1914_v55, %v678_v4  ;;  %1442 = vmatprep.mubr.f32.mxu0 %v771_v0  ;;  %v1220_v10 = vadd.f32 -1.0, %v1601_v1 }
 0x1e7   : > { %1612 = vpow2.f32 %v745_v2  ;;  %v718_v12 = vmin.f32 %v1972_v3, 0.0  ;;  %1443 = vmatmul.mubr.f32.gmra.mrb[20].mxu0 %v772_v9  ;;  %v1219_v13 = vadd.f32 -1.0, %v1603_v5  ;;  %vm702_vm1 = vcmp.gt.f32.partialorder %v1972_v3, 0.0 }
 0x1e8   : > { %1614 = vpow2.f32 %v743_v6  ;;  %v717_v14 = vmin.f32 %v679_v7, 0.0  ;;  %v774_v8 = vsel %vm694_vm8, %v1935_v16, %v1220_v10  ;;  %vm701_vm15 = vcmp.gt.f32.partialorder %v679_v7, 0.0 }
 0x1e9   : > { %v1605_v11 = vpop.eup %1604  ;;  %v749_v15 = vmul.f32 1.442695, %v718_v12  ;;  %v773_v17 = vsel %vm693_vm7, %v1938_v19, %v1219_v13 }
 0x1ea   : > { %v1607_v55 = vpop.eup %1606  ;;  %v747_v18 = vmul.f32 1.442695, %v717_v14  ;;  %1445 = vmatprep.mubr.f32.mxu0 %v773_v17  ;;  %v1222_v20 = vadd.f32 -1.0, %v1605_v11 }
 0x1eb   : > { %1616 = vpow2.f32 %v749_v15  ;;  %1446 = vmatmul.mubr.f32.gmra.mrb[22].mxu0 %v774_v8  ;;  %v1221_v21 = vadd.f32 -1.0, %v1607_v55 }
 0x1ec   : > { %1618 = vpow2.f32 %v747_v18  ;;  %v776_v24 = vsel %vm696_vm10, %v1943_v25, %v1222_v20 }
 0x1ed   : > { %v1609_v22 = vpop.eup %1608  ;;  %v775_v23 = vsel %vm695_vm9, %v1946_v30, %v1221_v21 }
 0x1ee   : > { %v1611_v19 = vpop.eup %1610  ;;  %1448 = vmatprep.mubr.f32.mxu0 %v775_v23  ;;  %v1224_v26 = vadd.f32 -1.0, %v1609_v22 }
 0x1ef   : > { %1449 = vmatmul.mubr.f32.gmra.mrb[24].mxu0 %v776_v24  ;;  %v1223_v27 = vadd.f32 -1.0, %v1611_v19  ;;  %v951_v24 = vlaneseq }
 0x1f0   : > { %v778_v30 = vsel %vm698_vm12, %v1951_v37, %v1224_v26 }
 0x1f1   : > { %v1613_v16 = vpop.eup %1612  ;;  %v777_v28 = vsel %vm697_vm11, %v1954_v43, %v1223_v27 }
 0x1f2   : > { %v1615_v29 = vpop.eup %1614  ;;  %1451 = vmatprep.mubr.f32.mxu0 %v777_v28  ;;  %v1226_v31 = vadd.f32 -1.0, %v1613_v16 }
 0x1f3   : > { %1452 = vmatmul.mubr.f32.gmra.mrb[26].mxu0 %v778_v30  ;;  %v1225_v32 = vadd.f32 -1.0, %v1615_v29 }
 0x1f4   : > { %v780_v36 = vsel %vm700_vm14, %v1960_v51, %v1226_v31 }
 0x1f5   : > { %v1617_v25 = vpop.eup %1616  ;;  %v779_v33 = vsel %vm699_vm13, %v1965_v57, %v1225_v32 }
 0x1f6   : > { %v1619_v34 = vpop.eup %1618  ;;  %v1228_v35 = vadd.f32 -1.0, %v1617_v25  ;;  %1454 = vmatprep.mubr.f32.mxu0 %v779_v33 }
 0x1f7   : > { %1455 = vmatmul.mubr.f32.gmra.mrb[28].mxu0 %v780_v36  ;;  %v1227_v38 = vadd.f32 -1.0, %v1619_v34 }
 0x1f8   : > { %v782_v39 = vsel %vm702_vm1, %v1972_v3, %v1228_v35 }
 0x1f9   : > { %v781_v37 = vsel %vm701_vm15, %v679_v7, %v1227_v38  ;;  %v2048_v38 = vand.u32 127, %v951_v24 }
 0x1fa   : > { %1457 = vmatprep.mubr.f32.mxu1 %v781_v37 }
 0x1fb   : > { %1458 = vmatmul.mubr.f32.vlgmr.msra.gmra.mrb[16].mxu1 %v782_v39  ;;  %vm953_vm2 = vcmp.ge.s32.totalorder %v2048_v38, 16 }
 0x2b2   : > { %v1438_v41 = vpop.f32.mrb[16].mxu0 }
 0x2b3   : > { %v2003_v42 = vadd.f32 %v1438_v41, %v2000_v40  ;;  %v872_v43 = vpop.f32.mrb[17].mxu0 }
 0x2b4   : > { %v2006_v44 = vadd.f32 %v2000_v40, %v872_v43 }
 0x2b5   : > { %v971_v45 = vand.u32 2147483647, %v2003_v42 }
 0x2b6   : > { %v970_v46 = vand.u32 2147483647, %v2006_v44  ;;  %v1441_v47 = vpop.f32.mrb[18].mxu0 }
 0x2b7   : > { %v987_v48 = vsub.f32 0.0, %v971_v45  ;;  %v2011_v49 = vadd.f32 %v1441_v47, %v2000_v40  ;;  %v882_v50 = vpop.f32.mrb[19].mxu0 }
 0x2b8   : > { %v986_v51 = vsub.f32 0.0, %v970_v46  ;;  %v2014_v52 = vadd.f32 %v2000_v40, %v882_v50 }
 0x2b9   : > { %v1004_v53 = vmul.f32 1.442695, %v987_v48  ;;  %v973_v54 = vand.u32 2147483647, %v2011_v49 }
 0x2ba   : > { %v1002_v56 = vmul.f32 1.442695, %v986_v51  ;;  %v972_v57 = vand.u32 2147483647, %v2014_v52  ;;  %v1444_v58 = vpop.f32.mrb[20].mxu0 }
 0x2bb   : > { %1620 = vpow2.f32 %v1004_v53  ;;  %v989_v59 = vsub.f32 0.0, %v973_v54  ;;  %v2019_v60 = vadd.f32 %v1444_v58, %v2000_v40  ;;  %v892_v61 = vpop.f32.mrb[21].mxu0 }
 0x2bc   : > { %1622 = vpow2.f32 %v1002_v56  ;;  %v988_v62 = vsub.f32 0.0, %v972_v57  ;;  %v2022_v63 = vadd.f32 %v2000_v40, %v892_v61 }
 0x2bd   : > { %v1008_v1 = vmul.f32 1.442695, %v989_v59  ;;  %v975_v2 = vand.u32 2147483647, %v2019_v60  ;;  %v955_v59 = vmax.f32 %v2003_v42, 0.0 }
 0x2be   : > { %v1006_v3 = vmul.f32 1.442695, %v988_v62  ;;  %v974_v4 = vand.u32 2147483647, %v2022_v63  ;;  %v1447_v0 = vpop.f32.mrb[22].mxu0 }
 0x2bf   : > { %1624 = vpow2.f32 %v1008_v1  ;;  %v991_v5 = vsub.f32 0.0, %v975_v2  ;;  %v2027_v6 = vadd.f32 %v1447_v0, %v2000_v40  ;;  %v902_v7 = vpop.f32.mrb[23].mxu0 }
 0x2c0   : > { %1626 = vpow2.f32 %v1006_v3  ;;  %v990_v9 = vsub.f32 0.0, %v974_v4  ;;  %v2030_v10 = vadd.f32 %v2000_v40, %v902_v7  ;;  %v954_v7 = vmax.f32 %v2006_v44, 0.0 }
 0x2c1   : > { %v1012_v12 = vmul.f32 1.442695, %v991_v5  ;;  %v977_v13 = vand.u32 2147483647, %v2027_v6 }
 0x2c2   : > { %v1010_v14 = vmul.f32 1.442695, %v990_v9  ;;  %v976_v11 = vand.u32 2147483647, %v2030_v10  ;;  %v1450_v15 = vpop.f32.mrb[24].mxu0  ;;  %v957_v9 = vmax.f32 %v2011_v49, 0.0 }
 0x2c3   : > { %1628 = vpow2.f32 %v1012_v12  ;;  %v993_v17 = vsub.f32 0.0, %v977_v13  ;;  %v2035_v55 = vadd.f32 %v1450_v15, %v2000_v40  ;;  %v912_v18 = vpop.f32.mrb[25].mxu0 }
 0x2c4   : > { %1630 = vpow2.f32 %v1010_v14  ;;  %v992_v8 = vsub.f32 0.0, %v976_v11  ;;  %v2038_v20 = vadd.f32 %v2000_v40, %v912_v18 }
 0x2c5   : > { %v1621_v21 = vpop.eup %1620  ;;  %v1016_v22 = vmul.f32 1.442695, %v993_v17  ;;  %v979_v23 = vand.u32 2147483647, %v2035_v55 }
 0x2c6   : > { %v1623_v19 = vpop.eup %1622  ;;  %v1035_v26 = vadd.f32 1.0, %v1621_v21  ;;  %v1014_v27 = vmul.f32 1.442695, %v992_v8  ;;  %v978_v16 = vand.u32 2147483647, %v2038_v20  ;;  %v1453_v30 = vpop.f32.mrb[26].mxu0 }
 0x2c7   : > { %v1034_v28 = vadd.f32 1.0, %v1623_v19  ;;  %1632 = vpow2.f32 %v1016_v22  ;;  %v995_v29 = vsub.f32 0.0, %v979_v23  ;;  %v2043_v32 = vadd.f32 %v1453_v30, %v2000_v40  ;;  %v922_v25 = vpop.f32.mrb[27].mxu0 }
 0x2c8   : > { %1634 = vlog2.f32 %v1035_v26  ;;  %v994_v31 = vsub.f32 0.0, %v978_v16  ;;  %v2046_v35 = vadd.f32 %v2000_v40, %v922_v25  ;;  %v956_v19 = vmax.f32 %v2014_v52, 0.0 }
 0x2c9   : > { %v1625_v33 = vpop.eup %1624  ;;  %1636 = vlog2.f32 %v1034_v28  ;;  %v1020_v34 = vmul.f32 1.442695, %v995_v29  ;;  %v981_v45 = vand.u32 2147483647, %v2043_v32 }
 0x2ca   : > { %v1627_v36 = vpop.eup %1626  ;;  %v1037_v37 = vadd.f32 1.0, %v1625_v33  ;;  %1638 = vpow2.f32 %v1014_v27  ;;  %v1018_v39 = vmul.f32 1.442695, %v994_v31  ;;  %v1456_v41 = vpop.f32.mrb[28].mxu0  ;;  %v980_v47 = vand.u32 2147483647, %v2046_v35 }
 0x2cb   : > { %v1036_v43 = vadd.f32 1.0, %v1627_v36  ;;  %1640 = vpow2.f32 %v1020_v34  ;;  %v932_v46 = vpop.f32.mrb[29].mxu0  ;;  %v2053_v48 = vadd.f32 %v1456_v41, %v2000_v40  ;;  %v997_v53 = vsub.f32 0.0, %v981_v45 }
 0x2cc   : > { %1642 = vlog2.f32 %v1037_v37  ;;  %v2056_v50 = vadd.f32 %v2000_v40, %v932_v46  ;;  %v996_v57 = vsub.f32 0.0, %v980_v47 }
 0x2cd   : > { %v1629_v51 = vpop.eup %1628  ;;  %1644 = vlog2.f32 %v1036_v43  ;;  %v1024_v62 = vmul.f32 1.442695, %v997_v53  ;;  %v983_v1 = vand.u32 2147483647, %v2053_v48 }
 0x2ce   : > { %v1631_v54 = vpop.eup %1630  ;;  %v1039_v56 = vadd.f32 1.0, %v1629_v51  ;;  %1646 = vpow2.f32 %v1018_v39  ;;  %v1459_v58 = vpop.f32.mrb[16].mxu1  ;;  %v1022_v2 = vmul.f32 1.442695, %v996_v57  ;;  %v982_v3 = vand.u32 2147483647, %v2056_v50 }
 0x2cf   : > { %v1038_v61 = vadd.f32 1.0, %v1631_v54  ;;  %v2063_v4 = vadd.f32 %v1459_v58, %v2000_v40  ;;  %v942_v0 = vpop.f32.mrb[17].mxu1  ;;  %v999_v12 = vsub.f32 0.0, %v983_v1 }
 0x2d0   : > { %1648 = vlog2.f32 %v1039_v56  ;;  %v998_v11 = vsub.f32 0.0, %v982_v3  ;;  %v2068_v15 = vadd.f32 %v2000_v40, %v942_v0 }
 0x2d1   : > { %v1633_v5 = vpop.eup %1632  ;;  %1650 = vlog2.f32 %v1038_v61  ;;  %v1028_v8 = vmul.f32 1.442695, %v999_v12  ;;  %v985_v21 = vand.u32 2147483647, %v2063_v4 }
 0x2d2   : > { %v1635_v13 = vpop.eup %1634  ;;  %v1041_v14 = vadd.f32 1.0, %v1633_v5  ;;  %1652 = vpow2.f32 %v1024_v62  ;;  %v1026_v24 = vmul.f32 1.442695, %v998_v11  ;;  %v984_v31 = vand.u32 2147483647, %v2068_v15 }
 0x2d3   : > { %v1637_v17 = vpop.eup %1636  ;;  %v1053_v18 = vmul.f32 0.6931472, %v1635_v13  ;;  %1654 = vpow2.f32 %v1022_v2  ;;  %v1001_v16 = vsub.f32 0.0, %v985_v21 }
 0x2d4   : > { %v1639_v22 = vpop.eup %1638  ;;  %v1051_v23 = vmul.f32 0.6931472, %v1637_v17  ;;  %1656 = vlog2.f32 %v1041_v14  ;;  %v1000_v43 = vsub.f32 0.0, %v984_v31 }
 0x2d5   : > { %v1641_v26 = vpop.eup %1640  ;;  %v1083_v40 = vadd.f32 %v1053_v18, %v955_v59  ;;  %v1040_v27 = vadd.f32 1.0, %v1639_v22  ;;  %1658 = vpow2.f32 %v1028_v8  ;;  %v1032_v36 = vmul.f32 1.442695, %v1001_v16 }
 0x2d6   : > { %v1643_v28 = vpop.eup %1642  ;;  %v1082_v29 = vadd.f32 %v1051_v23, %v954_v7  ;;  %v1043_v30 = vadd.f32 1.0, %v1641_v26  ;;  %1660 = vpow2.f32 %v1026_v24  ;;  %v1030_v51 = vmul.f32 1.442695, %v1000_v43 }
 0x2d7   : > { %v1645_v25 = vpop.eup %1644  ;;  %v1099_v33 = vsel %vm953_vm2, %v1083_v40, %v2003_v42  ;;  %v1057_v34 = vmul.f32 0.6931472, %v1643_v28  ;;  %1662 = vlog2.f32 %v1040_v27  ;;  %v958_v59 = vmax.f32 %v2022_v63, 0.0 }
 0x2d8   : > { %v1647_v37 = vpop.eup %1646  ;;  %1115 = vst.msk [vmem:[%s2077_s29 + $0x8] sm:$0xff] %vm309_vm0, %v1099_v33  ;;  %v1098_v39 = vsel %vm953_vm2, %v1082_v29, %v2006_v44  ;;  %v1055_v41 = vmul.f32 0.6931472, %v1645_v25  ;;  %1664 = vlog2.f32 %v1043_v30  ;;  %v959_v44 = vmax.f32 %v2019_v60, 0.0 }
 0x2d9   : > { %1114 = vst.msk [vmem:[%s2077_s29] sm:$0xff] %vm309_vm0, %v1098_v39  ;;  %v1085_v45 = vadd.f32 %v1057_v34, %v957_v9  ;;  %v1042_v46 = vadd.f32 1.0, %v1647_v37  ;;  %1666 = vpow2.f32 %v1032_v36  ;;  %v960_v8 = vmax.f32 %v2030_v10, 0.0 }
 0x2da   : > { %v1649_v42 = vpop.eup %1648  ;;  %v1084_v47 = vadd.f32 %v1055_v41, %v956_v19  ;;  %v962_v29 = vmax.f32 %v2038_v20, 0.0  ;;  %v965_v36 = vmax.f32 %v2043_v32, 0.0 }
 0x2db   : > { %v1651_v53 = vpop.eup %1650  ;;  %v1101_v54 = vsel %vm953_vm2, %v1085_v45, %v2011_v49  ;;  %v1061_v56 = vmul.f32 0.6931472, %v1649_v42  ;;  %1668 = vlog2.f32 %v1042_v46  ;;  %v967_v42 = vmax.f32 %v2053_v48, 0.0 }
 0x2dc   : > { %v1653_v57 = vpop.eup %1652  ;;  %1117 = vst.msk [vmem:[%s2077_s29 + $0x18] sm:$0xff] %vm309_vm0, %v1101_v54  ;;  %v1100_v58 = vsel %vm953_vm2, %v1084_v47, %v2014_v52  ;;  %v1059_v61 = vmul.f32 0.6931472, %v1651_v53  ;;  %1670 = vpow2.f32 %v1030_v51  ;;  %v961_v52 = vmax.f32 %v2027_v6, 0.0 }
 0x2dd   : > { %v1655_v62 = vpop.eup %1654  ;;  %1116 = vst.msk [vmem:[%s2077_s29 + $0x10] sm:$0xff] %vm309_vm0, %v1100_v58  ;;  %v1087_v49 = vadd.f32 %v1061_v56, %v959_v44  ;;  %v1045_v1 = vadd.f32 1.0, %v1653_v57  ;;  %v966_v51 = vmax.f32 %v2056_v50, 0.0  ;;  %v969_v58 = vmax.f32 %v2063_v4, 0.0 }
 0x2de   : > { %v1657_v2 = vpop.eup %1656  ;;  %v1086_v3 = vadd.f32 %v1059_v61, %v958_v59  ;;  %v1044_v0 = vadd.f32 1.0, %v1655_v62 }
 0x2df   : > { %v1659_v5 = vpop.eup %1658  ;;  %v1103_v7 = vsel %vm953_vm2, %v1087_v49, %v2019_v60  ;;  %v1065_v9 = vmul.f32 0.6931472, %v1657_v2  ;;  %1672 = vlog2.f32 %v1045_v1  ;;  %v968_v49 = vmax.f32 %v2068_v15, 0.0 }
 0x2e0   : > { %v1661_v12 = vpop.eup %1660  ;;  %1119 = vst.msk [vmem:[%s2077_s29 + $0x28] sm:$0xff] %vm309_vm0, %v1103_v7  ;;  %v1102_v13 = vsel %vm953_vm2, %v1086_v3, %v2022_v63  ;;  %1674 = vlog2.f32 %v1044_v0  ;;  %v1047_v14 = vadd.f32 1.0, %v1659_v5  ;;  %v963_v63 = vmax.f32 %v2035_v55, 0.0 }
 0x2e1   : > { %v1663_v11 = vpop.eup %1662  ;;  %1118 = vst.msk [vmem:[%s2077_s29 + $0x20] sm:$0xff] %vm309_vm0, %v1102_v13  ;;  %v1089_v17 = vadd.f32 %v1065_v9, %v961_v52  ;;  %v1046_v18 = vadd.f32 1.0, %v1661_v12 }
 0x2e2   : > { %v1665_v60 = vpop.eup %1664  ;;  %v1063_v21 = vmul.f32 0.6931472, %v1663_v11  ;;  %1676 = vlog2.f32 %v1047_v14 }
 0x2e3   : > { %v1667_v22 = vpop.eup %1666  ;;  %v1105_v23 = vsel %vm953_vm2, %v1089_v17, %v2027_v6  ;;  %v1069_v19 = vmul.f32 0.6931472, %v1665_v60  ;;  %1678 = vlog2.f32 %v1046_v18 }
 0x2e4   : > { %1121 = vst.msk [vmem:[%s2077_s29 + $0x38] sm:$0xff] %vm309_vm0, %v1105_v23  ;;  %v1088_v24 = vadd.f32 %v1063_v21, %v960_v8  ;;  %v1049_v26 = vadd.f32 1.0, %v1667_v22 }
 0x2e5   : > { %v1669_v40 = vpop.eup %1668  ;;  %v1091_v27 = vadd.f32 %v1069_v19, %v963_v63 }
 0x2e6   : > { %v1671_v16 = vpop.eup %1670  ;;  %v1104_v28 = vsel %vm953_vm2, %v1088_v24, %v2030_v10  ;;  %v1067_v6 = vmul.f32 0.6931472, %v1669_v40  ;;  %1680 = vlog2.f32 %v1049_v26 }
 0x2e7   : > { %1120 = vst.msk [vmem:[%s2077_s29 + $0x30] sm:$0xff] %vm309_vm0, %v1104_v28  ;;  %v1107_v30 = vsel %vm953_vm2, %v1091_v27, %v2035_v55  ;;  %v1048_v31 = vadd.f32 1.0, %v1671_v16  ;;  %v964_v55 = vmax.f32 %v2046_v35, 0.0 }
 0x2e8   : > { %1123 = vst.msk [vmem:[%s2077_s29 + $0x48] sm:$0xff] %vm309_vm0, %v1107_v30  ;;  %v1090_v25 = vadd.f32 %v1067_v6, %v962_v29 }
 0x2e9   : > { %v1673_v33 = vpop.eup %1672  ;;  %1682 = vlog2.f32 %v1048_v31 }
 0x2ea   : > { %v1675_v34 = vpop.eup %1674  ;;  %v1106_v10 = vsel %vm953_vm2, %v1090_v25, %v2038_v20  ;;  %v1073_v37 = vmul.f32 0.6931472, %v1673_v33 }
 0x2eb   : > { %1122 = vst.msk [vmem:[%s2077_s29 + $0x40] sm:$0xff] %vm309_vm0, %v1106_v10  ;;  %v1071_v39 = vmul.f32 0.6931472, %v1675_v34 }
 0x2ec   : > { %v1677_v41 = vpop.eup %1676  ;;  %v1093_v43 = vadd.f32 %v1073_v37, %v965_v36 }
 0x2ed   : > { %v1679_v45 = vpop.eup %1678  ;;  %v1092_v46 = vadd.f32 %v1071_v39, %v964_v55  ;;  %v1077_v47 = vmul.f32 0.6931472, %v1677_v41 }
 0x2ee   : > { %v1109_v20 = vsel %vm953_vm2, %v1093_v43, %v2043_v32  ;;  %v1075_v53 = vmul.f32 0.6931472, %v1679_v45 }
 0x2ef   : > { %1125 = vst.msk [vmem:[%s2077_s29 + $0x58] sm:$0xff] %vm309_vm0, %v1109_v20  ;;  %v1108_v54 = vsel %vm953_vm2, %v1092_v46, %v2046_v35  ;;  %v1095_v44 = vadd.f32 %v1077_v47, %v967_v42 }
 0x2f0   : > { %v1681_v56 = vpop.eup %1680  ;;  %1124 = vst.msk [vmem:[%s2077_s29 + $0x50] sm:$0xff] %vm309_vm0, %v1108_v54  ;;  %v1094_v57 = vadd.f32 %v1075_v53, %v966_v51 }
 0x2f1   : > { %v1111_v32 = vsel %vm953_vm2, %v1095_v44, %v2053_v48  ;;  %v1081_v59 = vmul.f32 0.6931472, %v1681_v56 }
 0x2f2   : > { %1127 = vst.msk [vmem:[%s2077_s29 + $0x68] sm:$0xff] %vm309_vm0, %v1111_v32  ;;  %v1110_v35 = vsel %vm953_vm2, %v1094_v57, %v2056_v50 }
 0x2f3   : > { %v1683_v61 = vpop.eup %1682  ;;  %1126 = vst.msk [vmem:[%s2077_s29 + $0x60] sm:$0xff] %vm309_vm0, %v1110_v35  ;;  %v1097_v62 = vadd.f32 %v1081_v59, %v969_v58 }
 0x2f4   : > { %v1079_v1 = vmul.f32 0.6931472, %v1683_v61 }
 0x2f5   : > { %v1113_v48 = vsel %vm953_vm2, %v1097_v62, %v2063_v4 }
 0x2f6   : > { %1129 = vst.msk [vmem:[%s2077_s29 + $0x78] sm:$0xff] %vm309_vm0, %v1113_v48  ;;  %v1096_v2 = vadd.f32 %v1079_v1, %v968_v49 }
 0x2f8   : > { %v1112_v3 = vsel %vm953_vm2, %v1096_v2, %v2068_v15 }
 0x2f9   : > { %1128 = vst.msk [vmem:[%s2077_s29 + $0x70] sm:$0xff] %vm309_vm0, %v1112_v3 }
 0x2fa PF: > { %s17_s24 = sadd.s32 1, %s1690_s24  }
 0x2fb   : > { %p14_p4 = scmp.ge.s32.totalorder %s17_s24, 4  }
 0x2fd   :  { %16 = sbr.rel (!%p14_p4) target bundleno = 1 (0x1), region = 78 }

</bundles_post_ra>
